<compile_context>
chip_gen: v7x
topology: tpu7x:2x2x1
jax: 0.10.0
libtpu: 0.0.40
codegen_flags: <defaults>
</compile_context>

<pallas_src>
import functools

import jax
import jax.numpy as jnp
from jax.experimental import pallas as pl
from jax.experimental.pallas import tpu as pltpu


def _choose_hw_tile(hw, c, max_tile_bytes):
    """Largest divisor of hw whose (C, tile) f32 block fits max_tile_bytes.

    Prefers lane-dense tiles (multiples of 128) so output stores are unmasked.
    """
    max_elems = max(128, max_tile_bytes // (4 * c))
    if hw <= max_elems:
        return hw
    divisors = [d for d in range(1, hw + 1) if hw % d == 0 and d <= max_elems]
    lane_dense = [d for d in divisors if d % 128 == 0]
    return max(lane_dense) if lane_dense else max(divisors)


def _pool_mlp_kernel(x_ref, w1t_ref, b1_ref, w2t_ref, b2_ref, scale_ref,
                     sum_acc, max_acc, *, inv_hw):
    """Streaming global avg/max pool over HW tiles; fused MLP + sigmoid at the end.

    x_ref:    (1, C, HW_TILE)      current spatial tile of one batch element
    w1t_ref:  (Ch, C)  = W1^T      b1_ref: (Ch, 1)
    w2t_ref:  (C, Ch)  = W2^T      b2_ref: (C, 1)
    scale_ref:(1, C, 1)            per-batch per-channel sigmoid gate
    sum_acc / max_acc: (C, 1) VMEM scratch, persistent across the HW grid axis.
    """
    t = pl.program_id(1)

    @pl.when(t == 0)
    def _init():
        sum_acc[...] = jnp.zeros_like(sum_acc)
        max_acc[...] = jnp.full_like(max_acc, -jnp.inf)

    x = x_ref[0]                                                 # (C, HW_TILE)
    sum_acc[...] += jnp.sum(x, axis=1, keepdims=True)            # (C, 1)
    max_acc[...] = jnp.maximum(max_acc[...],
                               jnp.max(x, axis=1, keepdims=True))

    @pl.when(t == pl.num_programs(1) - 1)
    def _finalize():
        # Stack avg/max pooled vectors -> single shared-MLP matmul chain (channel-major,
        # no transposes needed in-kernel).
        pooled_t = jnp.concatenate(
            [sum_acc[...] * inv_hw, max_acc[...]], axis=1)       # (C, 2)
        h_t = jnp.dot(w1t_ref[...], pooled_t,
                      preferred_element_type=jnp.float32) + b1_ref[...]   # (Ch, 2)
        h_t = jnp.maximum(h_t, 0.0)                              # ReLU
        att_t = jnp.dot(w2t_ref[...], h_t,
                        preferred_element_type=jnp.float32) + b2_ref[...]  # (C, 2)
        att = att_t[:, 0:1] + att_t[:, 1:2]                      # (C, 1): MLP(avg)+MLP(max)
        scale_ref[...] = jax.nn.sigmoid(att)[None]               # (1, C, 1), EUP exp path


def _scale_kernel(x_ref, scale_ref, o_ref):
    # x_ref/o_ref: (1, C, HW_TILE); scale_ref: (1, C, 1) broadcast along lanes.
    o_ref[...] = x_ref[...] * scale_ref[...]


def channel_gate(x_nchw, w1, b1, w2, b2, *, in_place=False,
                 max_tile_bytes=2 * 1024 * 1024):
    """CBAM channel gate: x * sigmoid(MLP(avgpool(x)) + MLP(maxpool(x))).

    x_nchw: (B, C, H, W) f32.  Linear weights stored (in, out): w1 (C, Ch), w2 (Ch, C).
    """
    B, C, H, W = x_nchw.shape
    HW = H * W
    Ch = w1.shape[1]
    x = x_nchw.reshape(B, C, HW)

    # Channel-major parameter layout so the kernel needs no transposes.
    w1_t = jnp.transpose(w1)          # (Ch, C)
    w2_t = jnp.transpose(w2)          # (C, Ch)
    b1_col = b1.reshape(Ch, 1)
    b2_col = b2.reshape(C, 1)

    hw_tile = _choose_hw_tile(HW, C, max_tile_bytes)
    n_tiles = HW // hw_tile
    tile_bytes = C * hw_tile * 4
    vmem_limit = int(min(32 * 1024 * 1024,
                         max(8 * 1024 * 1024, 6 * tile_bytes + (1 << 20))))

    # ---- Pass 1: streaming pooling + fused MLP + sigmoid -> per-batch (C,1) scale ----
    scale = pl.pallas_call(
        functools.partial(_pool_mlp_kernel, inv_hw=1.0 / float(HW)),
        out_shape=jax.ShapeDtypeStruct((B, C, 1), jnp.float32),
        grid_spec=pltpu.PrefetchScalarGridSpec(
            num_scalar_prefetch=0,
            grid=(B, n_tiles),
            in_specs=[
                pl.BlockSpec((1, C, hw_tile), lambda b, t: (b, 0, t)),
                pl.BlockSpec((Ch, C), lambda b, t: (0, 0)),   # tiny weights stay resident
                pl.BlockSpec((Ch, 1), lambda b, t: (0, 0)),
                pl.BlockSpec((C, Ch), lambda b, t: (0, 0)),
                pl.BlockSpec((C, 1), lambda b, t: (0, 0)),
            ],
            out_specs=pl.BlockSpec((1, C, 1), lambda b, t: (b, 0, 0)),
            scratch_shapes=[
                pltpu.VMEM((C, 1), jnp.float32),   # running sum over HW
                pltpu.VMEM((C, 1), jnp.float32),   # running max over HW
            ],
        ),
        compiler_params=pltpu.CompilerParams(
            dimension_semantics=("parallel", "arbitrary"),
            vmem_limit_bytes=vmem_limit,
        ),
    )(x, w1_t, b1_col, w2_t, b2_col)

    # ---- Pass 2: stream x again and apply the per-channel gate ----
    out = pl.pallas_call(
        _scale_kernel,
        out_shape=jax.ShapeDtypeStruct((B, C, HW), x.dtype),
        grid_spec=pltpu.PrefetchScalarGridSpec(
            num_scalar_prefetch=0,
            grid=(B, n_tiles),
            in_specs=[
                pl.BlockSpec((1, C, hw_tile), lambda b, t: (b, 0, t)),
                pl.BlockSpec((1, C, 1), lambda b, t: (b, 0, 0)),
            ],
            out_specs=pl.BlockSpec((1, C, hw_tile), lambda b, t: (b, 0, t)),
        ),
        compiler_params=pltpu.CompilerParams(
            dimension_semantics=("parallel", "parallel"),
            vmem_limit_bytes=vmem_limit,
        ),
        # Reuse x's HBM buffer for the output when the caller no longer needs x.
        input_output_aliases={0: 0} if in_place else {},
    )(x, scale)
    return out.reshape(B, C, H, W)


def reference_channel_gate(x, w1, b1, w2, b2):
    avg_p = jnp.mean(x, axis=(2, 3))
    max_p = jnp.max(x, axis=(2, 3))

    def mlp(p):
        h = jnp.maximum(p @ w1 + b1, 0.0)
        return h @ w2 + b2

    att = mlp(avg_p) + mlp(max_p)
    scale = jax.nn.sigmoid(att)[:, :, None, None]
    return x * scale


if __name__ == "__main__":
    # Small shapes consistent with the module: gate_channels=32, reduction=16.
    B, C, H, W = 2, 32, 16, 16
    reduction = 16
    Ch = C // reduction  # hidden dim = 2

    key = jax.random.PRNGKey(0)
    kx, k1, k2, k3, k4 = jax.random.split(key, 5)

    x = jax.random.normal(kx, (B, C, H, W), dtype=jnp.float32)
    # Deterministic synthetic parameters (Linear weights stored as (in, out)).
    w1 = jax.random.normal(k1, (C, Ch), dtype=jnp.float32) * 0.1
    b1 = jax.random.normal(k2, (Ch,), dtype=jnp.float32) * 0.1
    w2 = jax.random.normal(k3, (Ch, C), dtype=jnp.float32) * 0.1
    b2 = jax.random.normal(k4, (C,), dtype=jnp.float32) * 0.1

    ref = reference_channel_gate(x, w1, b1, w2, b2)

    # Single-tile path (HW fits in one lane-dense block).
    out = jax.block_until_ready(channel_gate(x, w1, b1, w2, b2))
    assert out.shape == (B, C, H, W)
    assert jnp.allclose(out, ref, atol=1e-5, rtol=1e-5), "mismatch vs reference"

    # Multi-tile path: force small HW tiles to exercise the streaming reduction
    # (same math, multiple grid steps along the 'arbitrary' axis).
    out_tiled = jax.block_until_ready(
        channel_gate(x, w1, b1, w2, b2, max_tile_bytes=16 * 1024))
    assert jnp.allclose(out_tiled, ref, atol=1e-5, rtol=1e-5), "tiled mismatch"

    print("KERNEL_OK")
</pallas_src>

<mosaic_0001>
module attributes {stable_mosaic.version = 11 : i64} {
  func.func @_pool_mlp_kernel(%arg0: i32, %arg1: i32, %arg2: memref<1x32x256xf32, #tpu.memory_space<vmem>>, %arg3: memref<2x32xf32, #tpu.memory_space<vmem>>, %arg4: memref<2x1xf32, #tpu.memory_space<vmem>>, %arg5: memref<32x2xf32, #tpu.memory_space<vmem>>, %arg6: memref<32x1xf32, #tpu.memory_space<vmem>>, %arg7: memref<1x32x1xf32, #tpu.memory_space<vmem>>, %arg8: memref<32x1xf32, #tpu.memory_space<vmem>>, %arg9: memref<32x1xf32, #tpu.memory_space<vmem>>) attributes {dimension_semantics = [#tpu.dimension_semantics<parallel>, #tpu.dimension_semantics<arbitrary>], iteration_bounds = array<i64: 2, 1>, scalar_prefetch = 0 : i64, scratch_operands = 2 : i64, tpu.core_type = #tpu.core_type<tc>, window_params = [{transform_indices = @transform_0, window_bounds = array<i64: 1, 32, 256>}, {pipeline_mode = #tpu.pipeline_mode<synchronous>, transform_indices = @transform_1, window_bounds = array<i64: 2, 32>}, {pipeline_mode = #tpu.pipeline_mode<synchronous>, transform_indices = @transform_2, window_bounds = array<i64: 2, 1>}, {pipeline_mode = #tpu.pipeline_mode<synchronous>, transform_indices = @transform_3, window_bounds = array<i64: 32, 2>}, {pipeline_mode = #tpu.pipeline_mode<synchronous>, transform_indices = @transform_4, window_bounds = array<i64: 32, 1>}, {transform_indices = @transform_5, window_bounds = array<i64: 1, 32, 1>}]} {
    %c0_i32 = arith.constant 0 : i32
    %0 = arith.cmpi eq, %arg1, %c0_i32 : i32
    %1 = arith.extui %0 : i1 to i32
    %c0_i32_0 = arith.constant 0 : i32
    %2 = arith.cmpi ne, %1, %c0_i32_0 : i32
    scf.if %2 {
      %cst_14 = arith.constant 0.000000e+00 : f32
      %18 = vector.broadcast %cst_14 : f32 to vector<32x1xf32>
      %c0_15 = arith.constant 0 : index
      %c0_16 = arith.constant 0 : index
      %19 = vector.load %arg8[%c0_15, %c0_16] : memref<32x1xf32, #tpu.memory_space<vmem>>, vector<32x1xf32>
      tpu.vector_store %arg8[%c0_15, %c0_16], %18 {strides = array<i32>} : memref<32x1xf32, #tpu.memory_space<vmem>>, vector<32x1xf32>,
      %cst_17 = arith.constant 0xFF800000 : f32
      %20 = vector.broadcast %cst_17 : f32 to vector<32x1xf32>
      %c0_18 = arith.constant 0 : index
      %c0_19 = arith.constant 0 : index
      %21 = vector.load %arg9[%c0_18, %c0_19] : memref<32x1xf32, #tpu.memory_space<vmem>>, vector<32x1xf32>
      tpu.vector_store %arg9[%c0_18, %c0_19], %20 {strides = array<i32>} : memref<32x1xf32, #tpu.memory_space<vmem>>, vector<32x1xf32>,
    } else {
    }
    %c0 = arith.constant 0 : index
    %c0_1 = arith.constant 0 : index
    %c0_2 = arith.constant 0 : index
    %3 = vector.load %arg2[%c0, %c0_1, %c0_2] : memref<1x32x256xf32, #tpu.memory_space<vmem>>, vector<1x32x256xf32>
    %4 = vector.shape_cast %3 : vector<1x32x256xf32> to vector<32x256xf32>
    %c0_3 = arith.constant 0 : index
    %c0_4 = arith.constant 0 : index
    %5 = vector.load %arg8[%c0_3, %c0_4] : memref<32x1xf32, #tpu.memory_space<vmem>>, vector<32x1xf32>
    %cst = arith.constant dense<0.000000e+00> : vector<32xf32>
    %6 = vector.multi_reduction <add>, %4, %cst [1] : vector<32x256xf32> to vector<32xf32>
    %7 = vector.shape_cast %6 : vector<32xf32> to vector<32x1xf32>
    %8 = arith.addf %5, %7 : vector<32x1xf32>
    %c0_5 = arith.constant 0 : index
    %c0_6 = arith.constant 0 : index
    %9 = vector.load %arg8[%c0_5, %c0_6] : memref<32x1xf32, #tpu.memory_space<vmem>>, vector<32x1xf32>
    tpu.vector_store %arg8[%c0_5, %c0_6], %8 {strides = array<i32>} : memref<32x1xf32, #tpu.memory_space<vmem>>, vector<32x1xf32>,
    %c0_7 = arith.constant 0 : index
    %c0_8 = arith.constant 0 : index
    %10 = vector.load %arg9[%c0_7, %c0_8] : memref<32x1xf32, #tpu.memory_space<vmem>>, vector<32x1xf32>
    %cst_9 = arith.constant dense<0xFF800000> : vector<32xf32>
    %11 = vector.multi_reduction <maximumf>, %4, %cst_9 [1] : vector<32x256xf32> to vector<32xf32>
    %12 = vector.shape_cast %11 : vector<32xf32> to vector<32x1xf32>
    %13 = arith.maximumf %10, %12 : vector<32x1xf32>
    %c0_10 = arith.constant 0 : index
    %c0_11 = arith.constant 0 : index
    %14 = vector.load %arg9[%c0_10, %c0_11] : memref<32x1xf32, #tpu.memory_space<vmem>>, vector<32x1xf32>
    tpu.vector_store %arg9[%c0_10, %c0_11], %13 {strides = array<i32>} : memref<32x1xf32, #tpu.memory_space<vmem>>, vector<32x1xf32>,
    %c0_i32_12 = arith.constant 0 : i32
    %15 = arith.cmpi eq, %arg1, %c0_i32_12 : i32
    %16 = arith.extui %15 : i1 to i32
    %c0_i32_13 = arith.constant 0 : i32
    %17 = arith.cmpi ne, %16, %c0_i32_13 : i32
    scf.if %17 {
      %c0_14 = arith.constant 0 : index
      %c0_15 = arith.constant 0 : index
      %18 = vector.load %arg8[%c0_14, %c0_15] : memref<32x1xf32, #tpu.memory_space<vmem>>, vector<32x1xf32>
      %cst_16 = arith.constant 3.906250e-03 : f32
      %19 = vector.broadcast %cst_16 : f32 to vector<32x1xf32>
      %20 = arith.mulf %18, %19 : vector<32x1xf32>
      %c0_17 = arith.constant 0 : index
      %c0_18 = arith.constant 0 : index
      %21 = vector.load %arg9[%c0_17, %c0_18] : memref<32x1xf32, #tpu.memory_space<vmem>>, vector<32x1xf32>
      %22 = tpu.concatenate %20, %21 in 1 : vector<32x1xf32>, vector<32x1xf32> -> vector<32x2xf32>
      %c0_19 = arith.constant 0 : index
      %c0_20 = arith.constant 0 : index
      %23 = vector.load %arg3[%c0_19, %c0_20] : memref<2x32xf32, #tpu.memory_space<vmem>>, vector<2x32xf32>
      %cst_21 = arith.constant dense<0.000000e+00> : vector<2x2xf32>
      %24 = tpu.matmul %23, %22, %cst_21 {dimension_numbers = #tpu.dot_dimension_numbers<[1], [0], [0], [1], [0, 0, 1, 1], [], []>} : vector<2x32xf32>, vector<32x2xf32>, vector<2x2xf32> -> vector<2x2xf32>
      %c0_22 = arith.constant 0 : index
      %c0_23 = arith.constant 0 : index
      %25 = vector.load %arg4[%c0_22, %c0_23] : memref<2x1xf32, #tpu.memory_space<vmem>>, vector<2x1xf32>
      %26 = vector.broadcast %25 : vector<2x1xf32> to vector<2x2xf32>
      %27 = arith.addf %24, %26 : vector<2x2xf32>
      %cst_24 = arith.constant 0.000000e+00 : f32
      %28 = vector.broadcast %cst_24 : f32 to vector<2x2xf32>
      %29 = arith.maximumf %27, %28 : vector<2x2xf32>
      %c0_25 = arith.constant 0 : index
      %c0_26 = arith.constant 0 : index
      %30 = vector.load %arg5[%c0_25, %c0_26] : memref<32x2xf32, #tpu.memory_space<vmem>>, vector<32x2xf32>
      %cst_27 = arith.constant dense<0.000000e+00> : vector<32x2xf32>
      %31 = tpu.matmul %30, %29, %cst_27 {dimension_numbers = #tpu.dot_dimension_numbers<[1], [0], [0], [1], [0, 0, 1, 1], [], []>} : vector<32x2xf32>, vector<2x2xf32>, vector<32x2xf32> -> vector<32x2xf32>
      %c0_28 = arith.constant 0 : index
      %c0_29 = arith.constant 0 : index
      %32 = vector.load %arg6[%c0_28, %c0_29] : memref<32x1xf32, #tpu.memory_space<vmem>>, vector<32x1xf32>
      %33 = vector.broadcast %32 : vector<32x1xf32> to vector<32x2xf32>
      %34 = arith.addf %31, %33 : vector<32x2xf32>
      %35 = vector.extract_strided_slice %34 {offsets = [0, 0], sizes = [32, 1], strides = [1, 1]} : vector<32x2xf32> to vector<32x1xf32>
      %36 = vector.extract_strided_slice %34 {offsets = [0, 1], sizes = [32, 1], strides = [1, 1]} : vector<32x2xf32> to vector<32x1xf32>
      %37 = arith.addf %35, %36 : vector<32x1xf32>
      %38 = arith.negf %37 : vector<32x1xf32>
      %39 = math.exp %38 : vector<32x1xf32>
      %cst_30 = arith.constant 1.000000e+00 : f32
      %40 = vector.broadcast %cst_30 : f32 to vector<32x1xf32>
      %41 = arith.addf %40, %39 : vector<32x1xf32>
      %42 = arith.divf %40, %41 : vector<32x1xf32>
      %43 = vector.shape_cast %42 : vector<32x1xf32> to vector<1x32x1xf32>
      %c0_31 = arith.constant 0 : index
      %c0_32 = arith.constant 0 : index
      %c0_33 = arith.constant 0 : index
      %44 = vector.load %arg7[%c0_31, %c0_32, %c0_33] : memref<1x32x1xf32, #tpu.memory_space<vmem>>, vector<1x32x1xf32>
      tpu.vector_store %arg7[%c0_31, %c0_32, %c0_33], %43 {strides = array<i32>} : memref<1x32x1xf32, #tpu.memory_space<vmem>>, vector<1x32x1xf32>,
    } else {
    }
    return
  }
  func.func @transform_0(%arg0: i32, %arg1: i32) -> (i32, i32, i32) {
    %c0_i32 = arith.constant 0 : i32
    %c0_i32_0 = arith.constant 0 : i32
    return %arg0, %c0_i32, %arg1 : i32, i32, i32
  }
  func.func @transform_1(%arg0: i32, %arg1: i32) -> (i32, i32) {
    %c0_i32 = arith.constant 0 : i32
    %c0_i32_0 = arith.constant 0 : i32
    %c0_i32_1 = arith.constant 0 : i32
    return %c0_i32, %c0_i32_0 : i32, i32
  }
  func.func @transform_2(%arg0: i32, %arg1: i32) -> (i32, i32) {
    %c0_i32 = arith.constant 0 : i32
    %c0_i32_0 = arith.constant 0 : i32
    %c0_i32_1 = arith.constant 0 : i32
    return %c0_i32, %c0_i32_0 : i32, i32
  }
  func.func @transform_3(%arg0: i32, %arg1: i32) -> (i32, i32) {
    %c0_i32 = arith.constant 0 : i32
    %c0_i32_0 = arith.constant 0 : i32
    %c0_i32_1 = arith.constant 0 : i32
    return %c0_i32, %c0_i32_0 : i32, i32
  }
  func.func @transform_4(%arg0: i32, %arg1: i32) -> (i32, i32) {
    %c0_i32 = arith.constant 0 : i32
    %c0_i32_0 = arith.constant 0 : i32
    %c0_i32_1 = arith.constant 0 : i32
    return %c0_i32, %c0_i32_0 : i32, i32
  }
  func.func @transform_5(%arg0: i32, %arg1: i32) -> (i32, i32, i32) {
    %c0_i32 = arith.constant 0 : i32
    %c0_i32_0 = arith.constant 0 : i32
    %c0_i32_1 = arith.constant 0 : i32
    return %arg0, %c0_i32, %c0_i32_0 : i32, i32, i32
  }
}

</mosaic_0001>

<bundles_post_ra>
// kernel: tpu_custom_call.1
= control target key start
LH: loop header
LB: loop body
LE: loop exit
PB: predicated region body
PF: predicated region fallthrough
CT: control target
= control target key end

     0   :  { %10 = vsyncpa [#allocation5], 0  ;;  %s1161_s0 = inlined_call_operand.hbm [shape: f32[2,32,256], index: 0, kind: input, shape index: {}]   ;;  %s1162_s1 = inlined_call_operand.vmem [shape: f32[2,32], index: 1, kind: input, shape index: {}]   ;;  %s1163_s2 = inlined_call_operand.vmem [shape: f32[2,1], index: 2, kind: input, shape index: {}]   ;;  %s1164_s3 = inlined_call_operand.vmem [shape: f32[32,2], index: 3, kind: input, shape index: {}]   ;;  %s1165_s4 = inlined_call_operand.vmem [shape: f32[32,1], index: 4, kind: input, shape index: {}]   ;;  %s1166_s5 = inlined_call_operand.vmem [shape: f32[2,32,1], index: 5, kind: output, shape index: {}]  }
   0x1   :  { %12 = vsyncpa [#allocation5 + $0x1], 0  ;;  %s979_s18 = smov 0   ;;  %s981_s19 = smov 0  }
   0x2   :  { %s983_s20 = smov 0   ;;  %s985_s21 = smov 0  }
   0x3   :  { %s987_s22 = smov 0   ;;  %s989_s23 = smov 0  }
   0x4 LB: > { %s705_s24 = sadd.s32 4294967295, %s937_s23   ;;  %s30_s25 = sadd.s32 1, %s933_s22  ;;  %s937_s23 = sphi %s989_s23, %s18_s23   ;;  %s933_s22 = sphi %s987_s22, %s1174_s22   ;;  %s929_s21 = sphi %s985_s21, %s1173_s21   ;;  %s925_s20 = sphi %s983_s20, %s1172_s20   ;;  %s921_s19 = sphi %s981_s19, %s1171_s19   ;;  %s917_s18 = sphi %s979_s18, %s1170_s18  }
   0x5   : > { %p32_p0 = scmp.ge.s32.totalorder %s30_s25, 2  ;;  %s39_s26 = sadd.s32 1, %s925_s20 }
   0x6   : > { %p46_p1 = scmp.ne.s32.totalorder %s925_s20, %s921_s19  ;;  %p47_p2 = scmp.eq.s32.totalorder %s937_s23, 0 }
   0x7   : > { %s1176_s25 = smov (%p32_p0, %s30_s25), 0  ;;  %p52_p4 = scmp.ne.s32.totalorder %s921_s19, %s917_s18 }
   0x8   : > { %p1015_p3 = por %p47_p2, %p46_p1  ;;  %s34_s28 = ssub.s32 %s933_s22, %s1176_s25 }
   0x9   : > { %p53_p5 = scmp.eq.s32.totalorder %s705_s24, 0  ;;  %p37_p6 = scmp.eq.s32.totalorder %s34_s28, 0 }
   0xa   : > { %p771_p8 = scmp.lt.s32.totalorder %s937_s23, 2  ;;  %s198_s6 = sand.u32 1, %s925_s20  }
   0xb   : > { %p1022_p7 = por %p53_p5, %p52_p4  ;;  %s728_s7 = sshll.u32 %s933_s22, 10 }
   0xc   : > { %s1028_s30 = scalar_select %p37_p6, %s925_s20, %s39_s26  }
   0xd   : > { %s709_s8 = sshll.u32 %s198_s6, 6  ;;  %s1035_s11 = scalar_lea.hbm %s1161_s0, %s728_s7 }
   0xe   : > { %s202_s12 = scalar_lea.vmem [#allocation4], %s709_s8  ;;  %p1039_p9 = pnand %p771_p8, %p1015_p3 }
   0xf   : > { %s211_s13 = sshll.u32 %s202_s12, 4  ;;  %s1045_s15 = scalar_lea.sflag [#allocation5], %s198_s6  ;;  %s1043_s13 = int_to_ptr.vmem [resolvable:$true] %s211_s13 }
  0x10   : > { %s857_s16 = scalar_lea.hbm %s1035_s11, 1024  ;;  %p859_p11 = pneg %p1039_p9 }
  0x11   : > { %p858_p10 = scmp.ne.s32.totalorder %s1035_s11, %s857_s16  ;;  %s862_s24 = scalar_lea.hbm %s1161_s0, 2048 }
  0x12   : > { %p863_p0 = scmp.lt.u32.totalorder %s1035_s11, %s1161_s0  ;;  %p864_p1 = scmp.lt.u32.totalorder %s862_s24, %s857_s16 }
  0x13   : > { %p860_p12 = pnand %p859_p11, %p858_p10  ;;  %p866_p3 = scmp.lt.u32.totalorder %s857_s16, %s1035_s11 }
  0x14   : > { %p865_p2 = por %p864_p1, %p863_p0 }
  0x15   : > { %p861_p13 = pneg %p860_p12 }
  0x16   : > { %p867_p4 = por %p866_p3, %p865_p2 }
  0x18   : > { %p868_p5 = pnand %p867_p4, %p861_p13 }
  0x1a   : > { %871 = shalt.err (!%p868_p5)
}
  0x1b   : > { %s872_s28 = scalar_lea.vmem %s1043_s13, 1024  ;;  %s939_s6 = smov [#allocation4]  }
  0x1c   : > { %p873_p6 = scmp.ne.s32.totalorder %s1043_s13, %s872_s28  ;;  %s877_s7 = sshll.u32 %s939_s6, 4  ;;  %s878_s7 = int_to_ptr.vmem [resolvable:$false] %s877_s7 }
  0x1d   : > { %s879_s8 = scalar_lea.vmem %s878_s7, 2048  ;;  %p880_p12 = scmp.lt.s32.totalorder %s1043_s13, %s878_s7 }
  0x1e   : > { %p875_p8 = pnand %p873_p6, %p859_p11  ;;  %p881_p0 = scmp.lt.s32.totalorder %s879_s8, %s872_s28 }
  0x20   : > { %p876_p10 = pneg %p875_p8  ;;  %p882_p1 = por %p881_p0, %p880_p12 }
  0x22   : > { %p883_p2 = pnand %p882_p1, %p876_p10 }
  0x24   : > { %886 = shalt.err (!%p883_p2)
}
  0x25   : > { %s940_s9 = smov 256   ;;  %s941_s10 = smov 16  }
  0x26   : > { %770 = dma.hbm_to_vmem [thread:$0]  (!%p1039_p9), %s1035_s11, 1024, %s1043_s13, %s1045_s15, %s940_s9, %s940_s9, %s941_s10  }
  0x27   : > { %p712_p11 = scmp.ge.s32.totalorder %s937_s23, 1  ;;  %p219_p13 = scmp.lt.s32.totalorder %s937_s23, 3 }
  0x29   : > { %p220_p3 = pnand %p712_p11, %p219_p13 }
  0x2a   : > { %s225_s12 = sand.u32 (!%p220_p3), 1, %s921_s19  }
  0x2b   : > { %223 = sbr.rel (%p220_p3) target bundleno = 921 (0x399), region = 40  ;;  %s713_s16 = sshll.u32 (!%p220_p3), %s225_s12, 6 }
  0x2c   : > { %s226_s17 = scalar_lea.sflag (!%p220_p3), [#allocation5], %s225_s12  ;;  %s229_s18 = scalar_lea.vmem (!%p220_p3), [#allocation4], %s713_s16 }
  0x32   : > { %912 = dma.done.wait (%p1022_p7), %s226_s17, 1024  }
  0x33   : > { %914 = vsyncadd (%p1022_p7), %s226_s17, 4294966272  ;;  %vm266_vm0 = vcmask 7168   ;;  %v942_v0 = vmov -inf   ;;  %v279_v1 = vld [vmem:[%s229_s18 + $0x20] sm:$0xff]  ;;  %v280_v2 = vld [vmem:[%s229_s18 + $0x28] sm:$0xff]  ;;  %v943_v17 = vmov 0.0  }
  0x34   : > { %273 = vst.msk [vmem:[#allocation3 + $0x10] sm:$0xff] %vm266_vm0, %v942_v0  ;;  %271 = vst.msk [vmem:[#allocation3] sm:$0xff] %vm266_vm0, %v942_v0  ;;  %v275_v3 = vld [vmem:[%s229_s18] sm:$0xff]  ;;  %v318_v4 = vmax.f32 %v279_v1, %v280_v2  ;;  %v276_v5 = vld [vmem:[%s229_s18 + $0x8] sm:$0xff]  ;;  %v293_v16 = vadd.f32 %v280_v2, %v279_v1  ;;  %v944_v31 = vmov 0.0|0.0   ;;  %vm945_vm1 = vmmov 0  }
  0x35   : > { %272 = vst.msk [vmem:[#allocation3 + $0x8] sm:$0xff] %vm266_vm0, %v942_v0  ;;  %274 = vst.msk [vmem:[#allocation3 + $0x18] sm:$0xff] %vm266_vm0, %v942_v0  ;;  %v281_v6 = vld [vmem:[%s229_s18 + $0x30] sm:$0xff]  ;;  %v282_v7 = vld [vmem:[%s229_s18 + $0x38] sm:$0xff]  ;;  %v312_v8 = vmax.f32 %v275_v3, %v276_v5  ;;  %v287_v14 = vadd.f32 %v276_v5, %v275_v3  ;;  %759 = vmatprep.subr.bf16.mxu0 %v944_v31  ;;  %748 = vmatprep.mubr.msk.f32.mxu0 %vm945_vm1, %v943_v17  ;;  %s946_s29 = smov 1   ;;  %v947_v49 = vmov 0  }
  0x36   : > { %v277_v9 = vld [vmem:[%s229_s18 + $0x10] sm:$0xff]  ;;  %v278_v10 = vld [vmem:[%s229_s18 + $0x18] sm:$0xff]  ;;  %319 = vmax.xlane.f32.xlu1 %v318_v4  ;;  %v321_v11 = vmax.f32 %v281_v6, %v282_v7  ;;  %v296_v15 = vadd.f32 %v282_v7, %v281_v6  ;;  %268 = vst.msk [vmem:[#allocation2 + $0x8] sm:$0xff] %vm266_vm0, %v943_v17  ;;  %267 = vst.msk [vmem:[#allocation2] sm:$0xff] %vm266_vm0, %v943_v17  ;;  %840 = vset.pattern.permute.xlu0 %v947_v49  ;;  %vm374_vm2 = vcmask 261120   ;;  %vm477_vm3 = vcmask 15360  }
  0x37   : > { %313 = vmax.xlane.f32.xlu0 %v312_v8  ;;  %v315_v12 = vmax.f32 %v277_v9, %v278_v10  ;;  %v290_v13 = vadd.f32 %v278_v10, %v277_v9  ;;  %269 = vst.msk [vmem:[#allocation2 + $0x10] sm:$0xff] %vm266_vm0, %v943_v17  ;;  %270 = vst.msk [vmem:[#allocation2 + $0x18] sm:$0xff] %vm266_vm0, %v943_v17  ;;  %839 = vset.pattern.permute.xlu1 %v947_v49  ;;  %v368_v50 = vld [vmem:[%s1163_s2] sm:$0x3]  ;;  %v455_v52 = vld [vmem:[%s1165_s4 + $0x10] sm:$0xff]  ;;  %vm490_vm4 = vcmask 1041408  }
  0x38   : > { %v453_v51 = vld [vmem:[%s1165_s4] sm:$0xff]  ;;  %v456_v53 = vld [vmem:[%s1165_s4 + $0x18] sm:$0xff]  ;;  %s948_s14 = smov 127   ;;  %p257_p7 = scmp.lt.s32.totalorder %s929_s21, 1 }
  0x39   : > { %v367_v10 = vld [vmem:[%s1162_s1] sm:$0x3] }
  0x3a   : > { %322 = vmax.xlane.f32.xlu1 %v321_v11  ;;  %v449_v11 = vld [vmem:[%s1164_s3] sm:$0xff]  ;;  %s1178_s21 = smov (!%p257_p7, %s929_s21), 1 }
  0x3b   : > { %316 = vmax.xlane.f32.xlu0 %v315_v12  ;;  %v310_v18 = vld [vmem:[#allocation3 + $0x10] sm:$0xff]  ;;  %v308_v19 = vld [vmem:[#allocation3] sm:$0xff]  ;;  %753 = vmatprep.mubr.msk.f32.mxu1 %vm477_vm3, %v449_v11  ;;  %v454_v12 = vld [vmem:[%s1165_s4 + $0x8] sm:$0xff]  ;;  %s729_s15 = sshll.u32 %s1178_s21, 5 }
  0x3c   : > { %v311_v24 = vld [vmem:[#allocation3 + $0x18] sm:$0xff]  ;;  %v309_v25 = vld [vmem:[#allocation3 + $0x8] sm:$0xff]  ;;  %s261_s27 = scalar_lea.vmem %s1166_s5, %s729_s15 }
  0x3d   : > { %v284_v30 = vld [vmem:[#allocation2 + $0x8] sm:$0xff]  ;;  %v283_v32 = vld [vmem:[#allocation2] sm:$0xff] }
  0x3e   : > { %291 = vadd.xlane.f32.xlu1 %v290_v13  ;;  %v286_v37 = vld [vmem:[#allocation2 + $0x18] sm:$0xff]  ;;  %v285_v38 = vld [vmem:[#allocation2 + $0x10] sm:$0xff] }
  0x3f   : > { %288 = vadd.xlane.f32.xlu0 %v287_v14 }
  0x42   : > { %297 = vadd.xlane.f32.xlu1 %v296_v15 }
  0x43   : > { %294 = vadd.xlane.f32.xlu0 %v293_v16 }
  0xc3   : > { %v320_v20 = vpop.xlane.xlu1 %319 }
  0xc4   : > { %v326_v21 = vmax.f32 %v310_v18, %v320_v20  ;;  %v314_v22 = vpop.xlane.xlu0 %313  ;;  %v450_v18 = vld [vmem:[%s1164_s3 + $0x8] sm:$0xff]  ;;  %v452_v20 = vld [vmem:[%s1164_s3 + $0x18] sm:$0xff] }
  0xc5   : > { %v324_v23 = vmax.f32 %v308_v19, %v314_v22  ;;  %v451_v19 = vld [vmem:[%s1164_s3 + $0x10] sm:$0xff] }
  0xc6   : > { %330 = vst.msk [vmem:[#allocation3 + $0x10] sm:$0xff] %vm266_vm0, %v326_v21 }
  0xc7   : > { %328 = vst.msk [vmem:[#allocation3] sm:$0xff] %vm266_vm0, %v324_v23  ;;  %v323_v26 = vpop.xlane.xlu1 %322 }
  0xc8   : > { %v327_v27 = vmax.f32 %v311_v24, %v323_v26  ;;  %v317_v28 = vpop.xlane.xlu0 %316 }
  0xc9   : > { %v325_v29 = vmax.f32 %v309_v25, %v317_v28 }
  0xca   : > { %331 = vst.msk [vmem:[#allocation3 + $0x18] sm:$0xff] %vm266_vm0, %v327_v27 }
  0xcb   : > { %329 = vst.msk [vmem:[#allocation3 + $0x8] sm:$0xff] %vm266_vm0, %v325_v29  ;;  %v292_v33 = vpop.xlane.xlu1 %291 }
  0xcc   : > { %v300_v34 = vadd.f32 %v292_v33, %v284_v30  ;;  %v289_v35 = vpop.xlane.xlu0 %288 }
  0xcd   : > { %v299_v36 = vadd.f32 %v289_v35, %v283_v32  ;;  %v345_v39 = vld [vmem:[#allocation3 + $0x10] sm:$0xff] }
  0xce   : > { %305 = vst.msk [vmem:[#allocation2 + $0x8] sm:$0xff] %vm266_vm0, %v300_v34  ;;  %v343_v46 = vld [vmem:[#allocation3] sm:$0xff] }
  0xcf   : > { %304 = vst.msk [vmem:[#allocation2] sm:$0xff] %vm266_vm0, %v299_v36  ;;  %v298_v40 = vpop.xlane.xlu1 %297 }
  0xd0   : > { %v302_v41 = vadd.f32 %v298_v40, %v286_v37  ;;  %v295_v42 = vpop.xlane.xlu0 %294 }
  0xd1   : > { %v346_v43 = vld [vmem:[#allocation3 + $0x18] sm:$0xff]  ;;  %v301_v44 = vadd.f32 %v295_v42, %v285_v38 }
  0xd2   : > { %v834_v45 = vpack.i.bf16 %v346_v43, %v345_v39  ;;  %v344_v47 = vld [vmem:[#allocation3 + $0x8] sm:$0xff]  ;;  %307 = vst.msk [vmem:[#allocation2 + $0x18] sm:$0xff] %vm266_vm0, %v302_v41 }
  0xd3   : > { %v829_v48 = vpack.i.bf16 %v344_v47, %v343_v46  ;;  %306 = vst.msk [vmem:[#allocation2 + $0x10] sm:$0xff] %vm266_vm0, %v301_v44 }
  0xd4   : > { %835 = vrot.lane.b32.xlu1 %v834_v45, %s946_s29 }
  0xd5   : > { %830 = vrot.lane.b32.xlu0 %v829_v48, %s946_s29  ;;  %v336_v55 = vld [vmem:[#allocation2 + $0x8] sm:$0xff] }
  0xd6   : > { %v335_v54 = vld [vmem:[#allocation2] sm:$0xff]  ;;  %v340_v60 = vmul.f32 0.00390625, %v336_v55 }
  0xd7   : > { %v339_v59 = vmul.f32 0.00390625, %v335_v54 }
  0xd8   : > { %371 = vperm.xlu1 %839, %v368_v50  }
  0xd9   : > { %v338_v57 = vld [vmem:[#allocation2 + $0x18] sm:$0xff]  ;;  %464 = vperm.xlu0 %840, %v454_v12  }
  0xda   : > { %v337_v56 = vld [vmem:[#allocation2 + $0x10] sm:$0xff]  ;;  %v342_v63 = vmul.f32 0.00390625, %v338_v57 }
  0xdb   : > { %v341_v62 = vmul.f32 0.00390625, %v337_v56 }
  0xdc   : > { %459 = vperm.xlu1 %839, %v453_v51  }
  0xe0   : > { %469 = vperm.xlu1 %839, %v455_v52  }
  0xe4   : > { %474 = vperm.xlu1 %839, %v456_v53  }
 0x146   : > { %v836_v58 = vpop.permute.xlu1 %835 }
 0x147   : > { %v831_v61 = vpop.permute.xlu0 %830  ;;  %v838_v0 = vunpack.i.h.bf16 %v836_v58  ;;  %v837_v1 = vunpack.i.l.bf16 %v836_v58 }
 0x148   : > { %v833_v2 = vunpack.i.h.bf16 %v831_v61  ;;  %v832_v3 = vunpack.i.l.bf16 %v831_v61 }
 0x149   : > { %v365_v7 = vsel %vm266_vm0, %v341_v62, %v837_v1  ;;  %v366_v8 = vsel %vm266_vm0, %v342_v63, %v838_v0 }
 0x14a   : > { %v363_v4 = vsel %vm266_vm0, %v339_v59, %v832_v3  ;;  %v364_v5 = vsel %vm266_vm0, %v340_v60, %v833_v2  ;;  %v763_v9 = vpack.c.bf16 %v366_v8, %v365_v7 }
 0x14b   : > { %v760_v6 = vpack.c.bf16 %v364_v5, %v363_v4 }
 0x14d   : > { %761 = vmatpush3.bf16.msra.mxu0 %v760_v6 }
 0x14e   : > { %762 = vmatprep.subr.bf16.mxu0 %v944_v31 }
 0x151   : > { %764 = vmatpush3.bf16.msra.mxu0 %v763_v9 }
 0x154   : > { %749 = vmatmul.mubr.msk.f32.vlgmr.msra.gmra.mrb[0].mxu0 %vm374_vm2, %v367_v10 }
 0x157   : > { %v372_v13 = vpop.permute.xlu1 %371 }
 0x158   : > { %v465_v23 = vpop.permute.xlu0 %464 }
 0x15b   : > { %v460_v21 = vpop.permute.xlu1 %459 }
 0x15f   : > { %v470_v22 = vpop.permute.xlu1 %469 }
 0x163   : > { %v475_v28 = vpop.permute.xlu1 %474 }
 0x227   : > { %v444_v14 = vpop.f32.mrb[0].mxu0 }
 0x228   : > { %v445_v15 = vadd.f32 %v444_v14, %v372_v13  ;;  %v750_v16 = vpop.f32.mrb[1].mxu0 }
 0x22a   : > { %v448_v17 = vmax.f32 %v445_v15, 0.0 }
 0x22c   : > { %751 = vmatprep.subr.msk.mxu1 %vm490_vm4, %v448_v17 }
 0x22d   : > { %752 = vmatpush3.msk.msra.mxu1 %vm490_vm4, %v448_v17 }
 0x22e   : > { %754 = vmatmul.mubr.msk.f32.vlgmr.msra.gmra.mrb[0].mxu1 %vm477_vm3, %v450_v18 }
 0x22f   : > { %756 = vmatprep.mubr.msk.f32.mxu1 %vm477_vm3, %v451_v19 }
 0x232   : > { %757 = vmatmul.mubr.msk.f32.gmra.mrb[2].mxu1 %vm477_vm3, %v452_v20 }
 0x301   : > { %v755_v24 = vpop.f32.mrb[0].mxu1 }
 0x302   : > { %v566_v25 = vadd.f32 %v755_v24, %v465_v23  ;;  %v560_v26 = vpop.f32.mrb[1].mxu1 }
 0x303   : > { %v561_v27 = vadd.f32 %v560_v26, %v460_v21 }
 0x304   : > { %585 = vrot.lane.b32.xlu1 %v566_v25, %s948_s14 }
 0x305   : > { %v758_v29 = vpop.f32.mrb[2].mxu1  ;;  %583 = vrot.lane.b32.xlu0 %v561_v27, %s948_s14 }
 0x306   : > { %v576_v30 = vadd.f32 %v758_v29, %v475_v28  ;;  %v570_v31 = vpop.f32.mrb[3].mxu1 }
 0x307   : > { %v571_v32 = vadd.f32 %v570_v31, %v470_v22 }
 0x308   : > { %589 = vrot.lane.b32.xlu1 %v576_v30, %s948_s14 }
 0x309   : > { %587 = vrot.lane.b32.xlu0 %v571_v32, %s948_s14 }
 0x376   : > { %v586_v33 = vpop.permute.xlu1 %585 }
 0x377   : > { %v596_v34 = vadd.f32 %v586_v33, %v566_v25  ;;  %v584_v35 = vpop.permute.xlu0 %583 }
 0x378   : > { %v595_v36 = vadd.f32 %v584_v35, %v561_v27 }
 0x379   : > { %v723_v37 = vmul.f32 -1.442695, %v596_v34 }
 0x37a   : > { %v722_v38 = vmul.f32 -1.442695, %v595_v36  ;;  %v590_v39 = vpop.permute.xlu1 %589 }
 0x37b   : > { %841 = vpow2.f32 %v723_v37  ;;  %v598_v40 = vadd.f32 %v590_v39, %v576_v30  ;;  %v588_v41 = vpop.permute.xlu0 %587 }
 0x37c   : > { %843 = vpow2.f32 %v722_v38  ;;  %v597_v42 = vadd.f32 %v588_v41, %v571_v32 }
 0x37d   : > { %v725_v43 = vmul.f32 -1.442695, %v598_v40 }
 0x37e   : > { %v724_v44 = vmul.f32 -1.442695, %v597_v42 }
 0x37f   : > { %845 = vpow2.f32 %v725_v43 }
 0x380   : > { %847 = vpow2.f32 %v724_v44 }
 0x385   : > { %v842_v45 = vpop.eup %841 }
 0x386   : > { %v844_v46 = vpop.eup %843  ;;  %v612_v47 = vadd.f32 1.0, %v842_v45 }
 0x387   : > { %v611_v48 = vadd.f32 1.0, %v844_v46 }
 0x388   : > { %849 = vrcp.f32 %v612_v47 }
 0x389   : > { %v846_v49 = vpop.eup %845  ;;  %851 = vrcp.f32 %v611_v48 }
 0x38a   : > { %v848_v50 = vpop.eup %847  ;;  %v614_v51 = vadd.f32 1.0, %v846_v49 }
 0x38b   : > { %v613_v52 = vadd.f32 1.0, %v848_v50 }
 0x38c   : > { %853 = vrcp.f32 %v614_v51 }
 0x38d   : > { %855 = vrcp.f32 %v613_v52 }
 0x392   : > { %v850_v53 = vpop.eup %849 }
 0x393   : > { %v852_v54 = vpop.eup %851  ;;  %624 = vst.msk [vmem:[%s261_s27 + $0x8] sm:$0xff] %vm266_vm0, %v850_v53 }
 0x394   : > { %623 = vst.msk [vmem:[%s261_s27] sm:$0xff] %vm266_vm0, %v852_v54 }
 0x396   : > { %v854_v55 = vpop.eup %853 }
 0x397   : > { %v856_v56 = vpop.eup %855  ;;  %626 = vst.msk [vmem:[%s261_s27 + $0x18] sm:$0xff] %vm266_vm0, %v854_v55 }
 0x398   : > { %625 = vst.msk [vmem:[%s261_s27 + $0x10] sm:$0xff] %vm266_vm0, %v856_v56 }
 0x399 PF: > { %s18_s23 = sadd.s32 1, %s937_s23   ;;  %s1170_s18 = smov %s921_s19 }
 0x39a   : > { %p15_p9 = scmp.ge.s32.totalorder %s18_s23, 4   ;;  %s1171_s19 = smov %s925_s20 }
 0x39b   : > { %s1172_s20 = smov %s1028_s30  ;;  %s1173_s21 = smov %s933_s22 }
 0x39c   : > { %s1174_s22 = smov %s1176_s25  ;;  %17 = sbr.rel (!%p15_p9) target bundleno = 4 (0x4), region = 88 }
 0x3a3   :  { %648 = vsyncpa [#allocation5], 1 }
 0x3a4   :  { %650 = vsyncpa [#allocation5 + $0x1], 1 }

</bundles_post_ra>
